<compile_context>
chip_gen: v7x
topology: tpu7x:2x2x1
jax: 0.10.0
libtpu: 0.0.40
codegen_flags: <defaults>
</compile_context>

<pallas_src>
import functools

import jax
import jax.numpy as jnp
from jax.experimental import pallas as pl
from jax.experimental.pallas import tpu as pltpu

_LANES = 128


def _iou_partials_kernel(x_ref, t_ref, o_ref,
                         inter_acc, xsum_acc, tsum_acc,
                         *, n_valid, tile_m, need_mask):
    """Grid = (B, n_tiles).  Axis 0 (batch) is parallel, axis 1 walks row-tiles
    of the (N//128, 128)-reshaped per-batch data.

    x_ref, t_ref : (tile_m, 128) tiles (batch dim squeezed)
    o_ref        : (3, 128) per-batch lane-wide partial sums
                   rows: [intersection, sum(sigmoid(x)), sum(t)]
    inter/xsum/tsum_acc : (8, 128) VMEM accumulators, persistent across tiles
    """
    k = pl.program_id(1)

    @pl.when(k == 0)
    def _():
        inter_acc[...] = jnp.zeros_like(inter_acc)
        xsum_acc[...] = jnp.zeros_like(xsum_acc)
        tsum_acc[...] = jnp.zeros_like(tsum_acc)

    x = jax.nn.sigmoid(x_ref[...].astype(jnp.float32))   # EUP
    t = t_ref[...].astype(jnp.float32)                    # narrow->f32 in VMEM

    if need_mask:
        # Zero out elements past the true flattened length N (lane padding
        # and/or the ragged last row-tile).
        row = jax.lax.broadcasted_iota(jnp.int32, (tile_m, _LANES), 0)
        lane = jax.lax.broadcasted_iota(jnp.int32, (tile_m, _LANES), 1)
        idx = (k * tile_m + row) * _LANES + lane
        valid = idx < n_valid
        x = jnp.where(valid, x, 0.0)
        t = jnp.where(valid, t, 0.0)

    xt = x * t

    if tile_m % 8 == 0:
        # Pure VPU accumulation: fold groups of 8 rows onto one (8,128) vreg.
        def fold(v):
            return v.reshape(tile_m // 8, 8, _LANES).sum(axis=0)
        inter_acc[...] += fold(xt)
        xsum_acc[...] += fold(x)
        tsum_acc[...] += fold(t)
    else:
        # Small-input fallback (single tile covering all rows, rows < 8 or
        # not a multiple of 8): one small sublane reduce per tile.
        inter_acc[0:1, :] += jnp.sum(xt, axis=0, keepdims=True)
        xsum_acc[0:1, :] += jnp.sum(x, axis=0, keepdims=True)
        tsum_acc[0:1, :] += jnp.sum(t, axis=0, keepdims=True)

    @pl.when(k == pl.num_programs(1) - 1)
    def _():
        # One sublane (XLU) reduce per batch; lane reduce happens in JAX.
        o_ref[0:1, :] = jnp.sum(inter_acc[...], axis=0, keepdims=True)
        o_ref[1:2, :] = jnp.sum(xsum_acc[...], axis=0, keepdims=True)
        o_ref[2:3, :] = jnp.sum(tsum_acc[...], axis=0, keepdims=True)


def _nearest_resize(t, out_hw):
    """PyTorch F.interpolate(mode='nearest') equivalent: src = floor(dst*in/out)."""
    B, Ht, Wt = t.shape
    H, W = out_hw
    if (Ht, Wt) == (H, W):
        return t
    ih = (jnp.arange(H) * Ht) // H
    iw = (jnp.arange(W) * Wt) // W
    return t[:, ih[:, None], iw[None, :]]


@functools.partial(jax.jit, static_argnames=("tile_m",))
def iou_loss(inputs, targets, *, tile_m=2048):
    """inputs: (B, C, H, W) logits; targets: (B, Ht, Wt) masks (any dtype).

    Returns a scalar float32 loss identical to the PyTorch IoULoss.forward.
    """
    assert tile_m >= 8 and tile_m % 8 == 0, "tile_m must be a multiple of 8"
    B = inputs.shape[0]
    assert targets.shape[0] == B

    # Nearest-neighbor resize of targets (wrapper-side gather, matches PyTorch).
    if inputs.shape[-2:] != targets.shape[-2:]:
        targets = _nearest_resize(targets, inputs.shape[-2:])

    x = inputs.reshape(B, -1)
    t = targets.reshape(B, -1)           # NOTE: no dtype cast here (done in-kernel)
    assert x.shape[1] == t.shape[1], "flattened sizes must match (C must be 1)"
    N = x.shape[1]

    # Reshape (free) to (B, R, 128); tiny pad only if N is not lane-aligned.
    R = pl.cdiv(N, _LANES)
    pad = R * _LANES - N
    if pad:
        x = jnp.pad(x, ((0, 0), (0, pad)))
        t = jnp.pad(t, ((0, 0), (0, pad)))
    x3 = x.reshape(B, R, _LANES)
    t3 = t.reshape(B, R, _LANES)

    tm = R if R <= tile_m else tile_m     # full dim (legal) or multiple of 8
    n_k = pl.cdiv(R, tm)
    need_mask = (n_k * tm * _LANES != N)

    kernel = functools.partial(
        _iou_partials_kernel, n_valid=N, tile_m=tm, need_mask=need_mask)

    partials = pl.pallas_call(
        kernel,
        out_shape=jax.ShapeDtypeStruct((B, 3, _LANES), jnp.float32),
        grid_spec=pltpu.PrefetchScalarGridSpec(
            num_scalar_prefetch=0,
            grid=(B, n_k),
            in_specs=[
                pl.BlockSpec((None, tm, _LANES), lambda b, k: (b, k, 0)),
                pl.BlockSpec((None, tm, _LANES), lambda b, k: (b, k, 0)),
            ],
            out_specs=pl.BlockSpec((None, 3, _LANES), lambda b, k: (b, 0, 0)),
            scratch_shapes=[
                pltpu.VMEM((8, _LANES), jnp.float32),  # intersection
                pltpu.VMEM((8, _LANES), jnp.float32),  # sum(sigmoid(x))
                pltpu.VMEM((8, _LANES), jnp.float32),  # sum(t)
            ],
        ),
        compiler_params=pltpu.CompilerParams(
            dimension_semantics=("parallel", "arbitrary"),
        ),
    )(x3, t3)

    # Tiny scalar epilogue in plain JAX (lane reduce + iou formula).
    sums = jnp.sum(partials, axis=-1)          # (B, 3)
    inter, x_sum, t_sum = sums[:, 0], sums[:, 1], sums[:, 2]
    union = x_sum + t_sum - inter
    iou = (inter + 1.0) / (union + 1.0)
    return 1.0 - jnp.mean(iou)


def iou_loss_ref(inputs, targets):
    """Pure-JAX reference matching the PyTorch module."""
    if inputs.shape[-2:] != targets.shape[-2:]:
        targets = _nearest_resize(targets.astype(jnp.float32), inputs.shape[-2:])
    x = jax.nn.sigmoid(inputs.astype(jnp.float32)).reshape(inputs.shape[0], -1)
    t = targets.astype(jnp.float32).reshape(targets.shape[0], -1)
    inter = jnp.sum(x * t, axis=1)
    union = jnp.sum(x, axis=1) + jnp.sum(t, axis=1) - inter
    iou = (inter + 1.0) / (union + 1.0)
    return 1.0 - jnp.mean(iou)


if __name__ == "__main__":
    key = jax.random.PRNGKey(0)

    def make_case(key, B, H, W, Ht=None, Wt=None):
        Ht = H if Ht is None else Ht
        Wt = W if Wt is None else Wt
        k1, k2 = jax.random.split(key)
        inputs = jax.random.normal(k1, (B, 1, H, W), dtype=jnp.float32)   # logits
        targets = (jax.random.uniform(k2, (B, Ht, Wt)) > 0.5).astype(jnp.float32)
        return inputs, targets

    keys = jax.random.split(key, 4)

    # 1) matched 16x16 (single tile, rows < 8 fallback path)
    inp, tgt = make_case(keys[0], 2, 16, 16)
    loss = iou_loss(inp, tgt)
    jax.block_until_ready(loss)
    assert jnp.allclose(loss, iou_loss_ref(inp, tgt), rtol=1e-5, atol=1e-5)

    # 2) matched 20x20 (lane padding + in-kernel masking path)
    inp, tgt = make_case(keys[1], 2, 20, 20)
    loss = iou_loss(inp, tgt)
    jax.block_until_ready(loss)
    assert jnp.allclose(loss, iou_loss_ref(inp, tgt), rtol=1e-5, atol=1e-5)

    # 3) matched 64x64, small tile_m to exercise multi-tile accumulation
    inp, tgt = make_case(keys[2], 2, 64, 64)
    loss = iou_loss(inp, tgt, tile_m=8)
    jax.block_until_ready(loss)
    assert jnp.allclose(loss, iou_loss_ref(inp, tgt), rtol=1e-5, atol=1e-5)

    # 4) mismatched spatial sizes -> nearest-interpolate branch (wrapper gather)
    inp, tgt = make_case(keys[3], 2, 16, 16, Ht=8, Wt=8)
    loss = iou_loss(inp, tgt)
    jax.block_until_ready(loss)
    assert jnp.allclose(loss, iou_loss_ref(inp, tgt), rtol=1e-5, atol=1e-5)

    print("KERNEL_OK")
</pallas_src>

<mosaic_0001>
module attributes {stable_mosaic.version = 11 : i64} {
  func.func @_iou_partials_kernel(%arg0: i32, %arg1: i32, %arg2: memref<1x2x128xf32, #tpu.memory_space<vmem>>, %arg3: memref<1x2x128xf32, #tpu.memory_space<vmem>>, %arg4: memref<1x3x128xf32, #tpu.memory_space<vmem>>, %arg5: memref<8x128xf32, #tpu.memory_space<vmem>>, %arg6: memref<8x128xf32, #tpu.memory_space<vmem>>, %arg7: memref<8x128xf32, #tpu.memory_space<vmem>>) attributes {dimension_semantics = [#tpu.dimension_semantics<parallel>, #tpu.dimension_semantics<arbitrary>], iteration_bounds = array<i64: 2, 1>, scalar_prefetch = 0 : i64, scratch_operands = 3 : i64, tpu.core_type = #tpu.core_type<tc>, window_params = [{transform_indices = @transform_0, window_bounds = array<i64: 1, 2, 128>}, {transform_indices = @transform_1, window_bounds = array<i64: 1, 2, 128>}, {transform_indices = @transform_2, window_bounds = array<i64: 1, 3, 128>}]} {
    %c0_i32 = arith.constant 0 : i32
    %0 = arith.cmpi eq, %arg1, %c0_i32 : i32
    %1 = arith.extui %0 : i1 to i32
    %c0_i32_0 = arith.constant 0 : i32
    %2 = arith.cmpi ne, %1, %c0_i32_0 : i32
    scf.if %2 {
      %cst_23 = arith.constant 0.000000e+00 : f32
      %31 = vector.broadcast %cst_23 : f32 to vector<8x128xf32>
      %c0_24 = arith.constant 0 : index
      %c0_25 = arith.constant 0 : index
      %32 = vector.load %arg5[%c0_24, %c0_25] : memref<8x128xf32, #tpu.memory_space<vmem>>, vector<8x128xf32>
      tpu.vector_store %arg5[%c0_24, %c0_25], %31 {strides = array<i32>} : memref<8x128xf32, #tpu.memory_space<vmem>>, vector<8x128xf32>,
      %cst_26 = arith.constant 0.000000e+00 : f32
      %33 = vector.broadcast %cst_26 : f32 to vector<8x128xf32>
      %c0_27 = arith.constant 0 : index
      %c0_28 = arith.constant 0 : index
      %34 = vector.load %arg6[%c0_27, %c0_28] : memref<8x128xf32, #tpu.memory_space<vmem>>, vector<8x128xf32>
      tpu.vector_store %arg6[%c0_27, %c0_28], %33 {strides = array<i32>} : memref<8x128xf32, #tpu.memory_space<vmem>>, vector<8x128xf32>,
      %cst_29 = arith.constant 0.000000e+00 : f32
      %35 = vector.broadcast %cst_29 : f32 to vector<8x128xf32>
      %c0_30 = arith.constant 0 : index
      %c0_31 = arith.constant 0 : index
      %36 = vector.load %arg7[%c0_30, %c0_31] : memref<8x128xf32, #tpu.memory_space<vmem>>, vector<8x128xf32>
      tpu.vector_store %arg7[%c0_30, %c0_31], %35 {strides = array<i32>} : memref<8x128xf32, #tpu.memory_space<vmem>>, vector<8x128xf32>,
    } else {
    }
    %c0 = arith.constant 0 : index
    %c0_1 = arith.constant 0 : index
    %c0_2 = arith.constant 0 : index
    %3 = vector.load %arg2[%c0, %c0_1, %c0_2] : memref<1x2x128xf32, #tpu.memory_space<vmem>>, vector<1x2x128xf32>
    %4 = vector.shape_cast %3 : vector<1x2x128xf32> to vector<2x128xf32>
    %5 = arith.negf %4 : vector<2x128xf32>
    %6 = math.exp %5 : vector<2x128xf32>
    %cst = arith.constant 1.000000e+00 : f32
    %7 = vector.broadcast %cst : f32 to vector<2x128xf32>
    %8 = arith.addf %7, %6 : vector<2x128xf32>
    %9 = arith.divf %7, %8 : vector<2x128xf32>
    %c0_3 = arith.constant 0 : index
    %c0_4 = arith.constant 0 : index
    %c0_5 = arith.constant 0 : index
    %10 = vector.load %arg3[%c0_3, %c0_4, %c0_5] : memref<1x2x128xf32, #tpu.memory_space<vmem>>, vector<1x2x128xf32>
    %11 = vector.shape_cast %10 : vector<1x2x128xf32> to vector<2x128xf32>
    %12 = arith.mulf %9, %11 : vector<2x128xf32>
    %c0_6 = arith.constant 0 : index
    %c0_7 = arith.constant 0 : index
    %13 = vector.load %arg5[%c0_6, %c0_7] : memref<8x128xf32, #tpu.memory_space<vmem>>, vector<1x128xf32>
    %cst_8 = arith.constant dense<0.000000e+00> : vector<128xf32>
    %14 = vector.multi_reduction <add>, %12, %cst_8 [0] : vector<2x128xf32> to vector<128xf32>
    %15 = vector.shape_cast %14 : vector<128xf32> to vector<1x128xf32>
    %16 = arith.addf %13, %15 : vector<1x128xf32>
    %c0_9 = arith.constant 0 : index
    %c0_10 = arith.constant 0 : index
    %17 = vector.load %arg5[%c0_9, %c0_10] : memref<8x128xf32, #tpu.memory_space<vmem>>, vector<1x128xf32>
    tpu.vector_store %arg5[%c0_9, %c0_10], %16 {strides = array<i32>} : memref<8x128xf32, #tpu.memory_space<vmem>>, vector<1x128xf32>,
    %c0_11 = arith.constant 0 : index
    %c0_12 = arith.constant 0 : index
    %18 = vector.load %arg6[%c0_11, %c0_12] : memref<8x128xf32, #tpu.memory_space<vmem>>, vector<1x128xf32>
    %cst_13 = arith.constant dense<0.000000e+00> : vector<128xf32>
    %19 = vector.multi_reduction <add>, %9, %cst_13 [0] : vector<2x128xf32> to vector<128xf32>
    %20 = vector.shape_cast %19 : vector<128xf32> to vector<1x128xf32>
    %21 = arith.addf %18, %20 : vector<1x128xf32>
    %c0_14 = arith.constant 0 : index
    %c0_15 = arith.constant 0 : index
    %22 = vector.load %arg6[%c0_14, %c0_15] : memref<8x128xf32, #tpu.memory_space<vmem>>, vector<1x128xf32>
    tpu.vector_store %arg6[%c0_14, %c0_15], %21 {strides = array<i32>} : memref<8x128xf32, #tpu.memory_space<vmem>>, vector<1x128xf32>,
    %c0_16 = arith.constant 0 : index
    %c0_17 = arith.constant 0 : index
    %23 = vector.load %arg7[%c0_16, %c0_17] : memref<8x128xf32, #tpu.memory_space<vmem>>, vector<1x128xf32>
    %cst_18 = arith.constant dense<0.000000e+00> : vector<128xf32>
    %24 = vector.multi_reduction <add>, %11, %cst_18 [0] : vector<2x128xf32> to vector<128xf32>
    %25 = vector.shape_cast %24 : vector<128xf32> to vector<1x128xf32>
    %26 = arith.addf %23, %25 : vector<1x128xf32>
    %c0_19 = arith.constant 0 : index
    %c0_20 = arith.constant 0 : index
    %27 = vector.load %arg7[%c0_19, %c0_20] : memref<8x128xf32, #tpu.memory_space<vmem>>, vector<1x128xf32>
    tpu.vector_store %arg7[%c0_19, %c0_20], %26 {strides = array<i32>} : memref<8x128xf32, #tpu.memory_space<vmem>>, vector<1x128xf32>,
    %c0_i32_21 = arith.constant 0 : i32
    %28 = arith.cmpi eq, %arg1, %c0_i32_21 : i32
    %29 = arith.extui %28 : i1 to i32
    %c0_i32_22 = arith.constant 0 : i32
    %30 = arith.cmpi ne, %29, %c0_i32_22 : i32
    scf.if %30 {
      %c0_23 = arith.constant 0 : index
      %c0_24 = arith.constant 0 : index
      %31 = vector.load %arg5[%c0_23, %c0_24] : memref<8x128xf32, #tpu.memory_space<vmem>>, vector<8x128xf32>
      %cst_25 = arith.constant dense<0.000000e+00> : vector<128xf32>
      %32 = vector.multi_reduction <add>, %31, %cst_25 [0] : vector<8x128xf32> to vector<128xf32>
      %33 = vector.shape_cast %32 : vector<128xf32> to vector<1x128xf32>
      %c0_26 = arith.constant 0 : index
      %c0_27 = arith.constant 0 : index
      %c0_28 = arith.constant 0 : index
      %34 = vector.load %arg4[%c0_26, %c0_27, %c0_28] : memref<1x3x128xf32, #tpu.memory_space<vmem>>, vector<1x1x128xf32>
      %35 = vector.shape_cast %34 : vector<1x1x128xf32> to vector<1x128xf32>
      %36 = vector.shape_cast %33 : vector<1x128xf32> to vector<1x1x128xf32>
      tpu.vector_store %arg4[%c0_26, %c0_27, %c0_28], %36 {strides = array<i32>} : memref<1x3x128xf32, #tpu.memory_space<vmem>>, vector<1x1x128xf32>,
      %c0_29 = arith.constant 0 : index
      %c0_30 = arith.constant 0 : index
      %37 = vector.load %arg6[%c0_29, %c0_30] : memref<8x128xf32, #tpu.memory_space<vmem>>, vector<8x128xf32>
      %cst_31 = arith.constant dense<0.000000e+00> : vector<128xf32>
      %38 = vector.multi_reduction <add>, %37, %cst_31 [0] : vector<8x128xf32> to vector<128xf32>
      %39 = vector.shape_cast %38 : vector<128xf32> to vector<1x128xf32>
      %c0_32 = arith.constant 0 : index
      %c1 = arith.constant 1 : index
      %c0_33 = arith.constant 0 : index
      %40 = vector.load %arg4[%c0_32, %c1, %c0_33] : memref<1x3x128xf32, #tpu.memory_space<vmem>>, vector<1x1x128xf32>
      %41 = vector.shape_cast %40 : vector<1x1x128xf32> to vector<1x128xf32>
      %42 = vector.shape_cast %39 : vector<1x128xf32> to vector<1x1x128xf32>
      tpu.vector_store %arg4[%c0_32, %c1, %c0_33], %42 {strides = array<i32>} : memref<1x3x128xf32, #tpu.memory_space<vmem>>, vector<1x1x128xf32>,
      %c0_34 = arith.constant 0 : index
      %c0_35 = arith.constant 0 : index
      %43 = vector.load %arg7[%c0_34, %c0_35] : memref<8x128xf32, #tpu.memory_space<vmem>>, vector<8x128xf32>
      %cst_36 = arith.constant dense<0.000000e+00> : vector<128xf32>
      %44 = vector.multi_reduction <add>, %43, %cst_36 [0] : vector<8x128xf32> to vector<128xf32>
      %45 = vector.shape_cast %44 : vector<128xf32> to vector<1x128xf32>
      %c0_37 = arith.constant 0 : index
      %c2 = arith.constant 2 : index
      %c0_38 = arith.constant 0 : index
      %46 = vector.load %arg4[%c0_37, %c2, %c0_38] : memref<1x3x128xf32, #tpu.memory_space<vmem>>, vector<1x1x128xf32>
      %47 = vector.shape_cast %46 : vector<1x1x128xf32> to vector<1x128xf32>
      %48 = vector.shape_cast %45 : vector<1x128xf32> to vector<1x1x128xf32>
      tpu.vector_store %arg4[%c0_37, %c2, %c0_38], %48 {strides = array<i32>} : memref<1x3x128xf32, #tpu.memory_space<vmem>>, vector<1x1x128xf32>,
    } else {
    }
    return
  }
  func.func @transform_0(%arg0: i32, %arg1: i32) -> (i32, i32, i32) {
    %c0_i32 = arith.constant 0 : i32
    %c0_i32_0 = arith.constant 0 : i32
    return %arg0, %arg1, %c0_i32 : i32, i32, i32
  }
  func.func @transform_1(%arg0: i32, %arg1: i32) -> (i32, i32, i32) {
    %c0_i32 = arith.constant 0 : i32
    %c0_i32_0 = arith.constant 0 : i32
    return %arg0, %arg1, %c0_i32 : i32, i32, i32
  }
  func.func @transform_2(%arg0: i32, %arg1: i32) -> (i32, i32, i32) {
    %c0_i32 = arith.constant 0 : i32
    %c0_i32_0 = arith.constant 0 : i32
    %c0_i32_1 = arith.constant 0 : i32
    return %arg0, %c0_i32, %c0_i32_0 : i32, i32, i32
  }
}

</mosaic_0001>

<bundles_post_ra>
// kernel: iou_loss.1
= control target key start
LH: loop header
LB: loop body
LE: loop exit
PB: predicated region body
PF: predicated region fallthrough
CT: control target
= control target key end

     0   :  { %s423_s9 = smov 0   ;;  %s425_s10 = smov 0   ;;  %s471_s0 = inlined_call_operand.vmem [shape: f32[2,2,128], index: 0, kind: input, shape index: {}]   ;;  %s472_s1 = inlined_call_operand.vmem [shape: f32[2,2,128], index: 1, kind: input, shape index: {}]   ;;  %s473_s2 = inlined_call_operand.vmem [shape: f32[2,3,128], index: 2, kind: output, shape index: {}]  }
   0x1   :  { %s427_s11 = smov 0  }
   0x2 LB: > { %s24_s12 = sadd.s32 1, %s401_s10  ;;  %p347_p0 = scmp.ge.s32.totalorder %s405_s11, 1  ;;  %s405_s11 = sphi %s427_s11, %s12_s11   ;;  %s401_s10 = sphi %s425_s10, %s475_s10   ;;  %s397_s9 = sphi %s423_s9, %s474_s9  }
   0x3   : > { %p26_p1 = scmp.ge.s32.totalorder %s24_s12, 2  ;;  %p142_p2 = scmp.lt.s32.totalorder %s405_s11, 3 }
   0x5   : > { %s477_s12 = smov (%p26_p1, %s24_s12), 0  ;;  %p143_p3 = pnand %p347_p0, %p142_p2 }
   0x6   : > { %p172_p4 = scmp.lt.s32.totalorder (!%p143_p3), %s397_s9, 1  ;;  %v407_v0 = vmov (!%p143_p3), 0.0   ;;  %vm207_vm0 = vcmask (!%p143_p3), 1041408  }
   0x7   : > { %146 = sbr.rel (%p143_p3) target bundleno = 82 (0x52), region = 28  ;;  %196 = vst [vmem:[#allocation4] sm:$0xff] (!%p143_p3), %v407_v0  ;;  %194 = vst [vmem:[#allocation2] sm:$0xff] (!%p143_p3), %v407_v0 }
   0x8   : > { %195 = vst [vmem:[#allocation3] sm:$0xff] (!%p143_p3), %v407_v0 }
   0xe   : > { %s479_s9 = smov (!%p172_p4, %s397_s9), 1  ;;  %v227_v10 = vld [vmem:[#allocation4] sm:$0x1]  ;;  %v206_v38 = vld [vmem:[#allocation2] sm:$0x1] }
   0xf   : > { %s348_s13 = sshll.u32 %s479_s9, 1  ;;  %s350_s20 = sshll.u32 %s479_s9, 2  ;;  %v217_v35 = vld [vmem:[#allocation3] sm:$0x1] }
  0x10   : > { %s178_s16 = scalar_lea.vmem %s471_s0, %s348_s13  ;;  %s185_s19 = scalar_lea.vmem %s472_s1, %s348_s13 }
  0x11   : > { %v197_v1 = vld [vmem:[%s178_s16] sm:$0x3]  ;;  %s457_s23 = scalar_lea.vmem %s473_s2, %s350_s20 }
  0x12   : > { %v204_v2 = vld [vmem:[%s185_s19] sm:$0x3]  ;;  %v351_v3 = vmul.f32 -1.442695, %v197_v1 }
  0x13   : > { %v228_v4 = vsel %vm207_vm0, %v204_v2, 0.0 }
  0x14   : > { %v229_v5 = vrot.slane %v228_v4, 4  ;;  %379 = vpow2.f32 %v351_v3 }
  0x16   : > { %v230_v6 = vadd.f32 %v229_v5, %v228_v4 }
  0x18   : > { %v231_v7 = vrot.slane %v230_v6, 2 }
  0x1a   : > { %v232_v8 = vadd.f32 %v231_v7, %v230_v6 }
  0x1c   : > { %v233_v9 = vrot.slane %v232_v8, 1 }
  0x1e   : > { %v234_v11 = vadd.f32 %v233_v9, %v232_v8  ;;  %v380_v12 = vpop.eup %379 }
  0x1f   : > { %v201_v13 = vadd.f32 1.0, %v380_v12 }
  0x20   : > { %v235_v14 = vadd.f32 %v234_v11, %v227_v10 }
  0x21   : > { %381 = vrcp.f32 %v201_v13 }
  0x22   : > { %236 = vst [vmem:[#allocation4] sm:$0x1] %v235_v14 }
  0x29   : > { %v256_v15 = vld [vmem:[#allocation4] sm:$0xff] }
  0x2a   : > { %v257_v16 = vrot.slane %v256_v15, 4 }
  0x2b   : > { %v382_v17 = vpop.eup %381 }
  0x2c   : > { %v258_v18 = vadd.f32 %v257_v16, %v256_v15  ;;  %v218_v19 = vsel %vm207_vm0, %v382_v17, 0.0  ;;  %v205_v20 = vmul.f32 %v382_v17, %v204_v2 }
  0x2d   : > { %v219_v21 = vrot.slane %v218_v19, 4 }
  0x2e   : > { %v259_v22 = vrot.slane %v258_v18, 2  ;;  %v208_v23 = vsel %vm207_vm0, %v205_v20, 0.0 }
  0x2f   : > { %v220_v24 = vadd.f32 %v219_v21, %v218_v19  ;;  %v209_v25 = vrot.slane %v208_v23, 4 }
  0x30   : > { %v260_v26 = vadd.f32 %v259_v22, %v258_v18 }
  0x31   : > { %v221_v27 = vrot.slane %v220_v24, 2  ;;  %v210_v28 = vadd.f32 %v209_v25, %v208_v23 }
  0x32   : > { %v261_v29 = vrot.slane %v260_v26, 1 }
  0x33   : > { %v222_v30 = vadd.f32 %v221_v27, %v220_v24  ;;  %v211_v31 = vrot.slane %v210_v28, 2 }
  0x34   : > { %v262_v32 = vadd.f32 %v261_v29, %v260_v26 }
  0x35   : > { %v223_v33 = vrot.slane %v222_v30, 1  ;;  %v212_v34 = vadd.f32 %v211_v31, %v210_v28 }
  0x36   : > { %263 = vst [vmem:[%s457_s23 + $0x2] sm:$0x1] %v262_v32 }
  0x37   : > { %v224_v36 = vadd.f32 %v223_v33, %v222_v30  ;;  %v213_v37 = vrot.slane %v212_v34, 1 }
  0x39   : > { %v225_v39 = vadd.f32 %v224_v36, %v217_v35  ;;  %v214_v40 = vadd.f32 %v213_v37, %v212_v34 }
  0x3b   : > { %226 = vst [vmem:[#allocation3] sm:$0x1] %v225_v39  ;;  %v215_v41 = vadd.f32 %v214_v40, %v206_v38 }
  0x3d   : > { %216 = vst [vmem:[#allocation2] sm:$0x1] %v215_v41 }
  0x42   : > { %v248_v42 = vld [vmem:[#allocation3] sm:$0xff] }
  0x43   : > { %v249_v43 = vrot.slane %v248_v42, 4 }
  0x44   : > { %v240_v44 = vld [vmem:[#allocation2] sm:$0xff] }
  0x45   : > { %v250_v45 = vadd.f32 %v249_v43, %v248_v42  ;;  %v241_v46 = vrot.slane %v240_v44, 4 }
  0x47   : > { %v251_v47 = vrot.slane %v250_v45, 2  ;;  %v242_v48 = vadd.f32 %v241_v46, %v240_v44 }
  0x49   : > { %v252_v49 = vadd.f32 %v251_v47, %v250_v45  ;;  %v243_v50 = vrot.slane %v242_v48, 2 }
  0x4b   : > { %v253_v51 = vrot.slane %v252_v49, 1  ;;  %v244_v52 = vadd.f32 %v243_v50, %v242_v48 }
  0x4d   : > { %v254_v53 = vadd.f32 %v253_v51, %v252_v49  ;;  %v245_v54 = vrot.slane %v244_v52, 1 }
  0x4f   : > { %255 = vst [vmem:[%s457_s23 + $0x1] sm:$0x1] %v254_v53  ;;  %v246_v55 = vadd.f32 %v245_v54, %v244_v52 }
  0x51   : > { %247 = vst [vmem:[%s457_s23] sm:$0x1] %v246_v55 }
  0x52 PF: > { %s12_s11 = sadd.s32 1, %s405_s11   ;;  %s474_s9 = smov %s401_s10 }
  0x53   : > { %p9_p5 = scmp.ge.s32.totalorder %s12_s11, 4   ;;  %s475_s10 = smov %s477_s12 }
  0x55   :  { %11 = sbr.rel (!%p9_p5) target bundleno = 2 (0x2), region = 69 }

</bundles_post_ra>
